<compile_context>
chip_gen: v7x
topology: tpu7x:2x2x1
jax: 0.10.0
libtpu: 0.0.40
codegen_flags: <defaults>
</compile_context>

<pallas_src>
import jax
import jax.numpy as jnp
from jax import lax
from jax.experimental import pallas as pl
from jax.experimental.pallas import tpu as pltpu


def _round_up(x, m):
    return ((x + m - 1) // m) * m


# ----------------------------------------------------------------------------
# Fused loss kernel.
#   logits_ref : (C, TB, 128)  native dtype, lane-dense tile of class logits
#   tgt_ref    : (TB, 128)     int32 target class per query (-1 = padding)
#   pleft_ref  : (M, L)        boundary probs (left)  of matched spans
#   pright_ref : (M, L)        boundary probs (right) of matched spans
#   sl_ref     : (M, 1)        int32 target left positions
#   sr_ref     : (M, 1)        int32 target right positions
#   num_out    : (8, 128)      per-core partial CE numerator   (summed in glue)
#   den_out    : (8, 128)      per-core partial CE denominator (summed in glue)
#   bnd_out    : (8, 128)      boundary NLL / num_spans (broadcast scalar)
#   num_acc/den_acc : (8, 128) f32 VMEM accumulators
# ----------------------------------------------------------------------------
def _make_fused_loss_kernel(C, TB, w0, inv_num_spans):
    eps = 1e-25

    def kernel(logits_ref, tgt_ref, pleft_ref, pright_ref, sl_ref, sr_ref,
               num_out, den_out, bnd_out, num_acc, den_acc):
        i = pl.program_id(1)
        last = pl.num_programs(1) - 1

        @pl.when(i == 0)
        def _init():
            num_acc[...] = jnp.zeros_like(num_acc)
            den_acc[...] = jnp.zeros_like(den_acc)
            # ---- boundary NLL (tiny); done in warm-up so it hides under the
            # first tile's prefetch instead of extending the drain ----
            p_l = pleft_ref[...].astype(jnp.float32)               # (M, L)
            p_r = pright_ref[...].astype(jnp.float32)
            M, L = p_l.shape
            lane = lax.broadcasted_iota(jnp.int32, (M, L), 1)
            pick_l = jnp.sum(jnp.where(lane == sl_ref[...], jnp.log(eps + p_l), 0.0),
                             axis=-1, keepdims=True)               # (M, 1)
            pick_r = jnp.sum(jnp.where(lane == sr_ref[...], jnp.log(eps + p_r), 0.0),
                             axis=-1, keepdims=True)
            total = jnp.sum(-(pick_l + pick_r), axis=(0, 1), keepdims=True)  # (1,1)
            bnd_out[...] = jnp.broadcast_to(total, bnd_out.shape) * inv_num_spans

        # ---- weighted cross-entropy over this lane-dense column tile ----
        tgt = tgt_ref[...]                                          # (TB, 128) int32
        xs = [logits_ref[c].astype(jnp.float32) for c in range(C)]  # C x (TB, 128)

        m = xs[0]
        for c in range(1, C):
            m = jnp.maximum(m, xs[c])                               # per-query max

        s = jnp.zeros_like(m)
        picked = jnp.zeros_like(m)
        for c in range(C):
            s = s + jnp.exp(xs[c] - m)
            picked = picked + jnp.where(tgt == c, xs[c], 0.0)       # logit of target class
        lse = m + jnp.log(s)                                        # per-query logsumexp

        w = jnp.where(tgt == 0, jnp.float32(w0), jnp.float32(1.0))
        w = jnp.where(tgt < 0, jnp.float32(0.0), w)                 # sentinel = padding
        num_row = w * (lse - picked)                                # w * (-log p[target])

        # Fold (TB, 128) -> (8, 128) with vreg-aligned slice adds (pure VPU);
        # the full cross-lane reduce is deferred to glue.
        folded_num = num_row[0:8]
        folded_den = w[0:8]
        for r in range(8, TB, 8):
            folded_num = folded_num + num_row[r:r + 8]
            folded_den = folded_den + w[r:r + 8]
        num_acc[...] += folded_num
        den_acc[...] += folded_den

        @pl.when(i == last)
        def _finalize():
            num_out[...] = num_acc[...]
            den_out[...] = den_acc[...]

    return kernel


# ----------------------------------------------------------------------------
# Criterion.forward glue (plain JAX): matcher + index bookkeeping; both losses
# come out of a single fused Pallas kernel.
# ----------------------------------------------------------------------------
def criterion_forward(outputs, targets, *, max_tile_cols=32768, num_cores=2):
    pred_logits = outputs["pred_logits"]                 # (B, Q, C) native dtype
    pred_left, pred_right = outputs["pred_boundaries"]   # each (B, Q, L)
    B, Q, C = pred_logits.shape
    L = pred_left.shape[-1]

    sizes = targets["sizes"]                             # python list (static)
    labels = targets["labels"]                           # (M,) int32
    spans = targets["spans"]                             # (M, 2) int32
    M = int(sum(sizes))
    num_spans = float(M)
    N = B * Q

    # TODO(synk): Hungarian matcher (scipy linear_sum_assignment) has no Pallas
    # equivalent; use deterministic identity matching (query j <-> target j).
    # TODO(synk): loss_boundary_discontinuous (spans with > 2 columns) not implemented.
    batch_idx = jnp.concatenate(
        [jnp.full((n,), b, dtype=jnp.int32) for b, n in enumerate(sizes)])
    src_idx = jnp.concatenate([jnp.arange(n, dtype=jnp.int32) for n in sizes])

    # Class targets (scatter stays in glue; kernel builds masks from int32).
    target_classes = jnp.zeros((B, Q), jnp.int32).at[batch_idx, src_idx].set(
        labels.astype(jnp.int32))

    # ---- tiling: big lane-dense tiles, split across (up to) 2 TensorCores ----
    NC = num_cores
    TN0 = min(max_tile_cols, _round_up(N, 1024))
    tiles_per_core = max(1, -(-N // (NC * TN0)))
    TN = _round_up(-(-N // (NC * tiles_per_core)), 1024)   # shrink to reduce padding
    total_cols = NC * tiles_per_core * TN
    TB = TN // 128                                          # sublane rows per tile
    R = total_cols // 128

    # Class-major lane-dense layout: class dim on the leading axis, queries
    # packed densely onto (sublane, lane).
    # TODO(synk): emit pred_logits as (C, B*Q) upstream to kill this HBM pass.
    logits_t = jnp.transpose(pred_logits.reshape(N, C))             # (C, N)
    logits_t = jnp.pad(logits_t, ((0, 0), (0, total_cols - N)))     # zero pad
    logits_t = logits_t.reshape(C, R, 128)

    tgt = jnp.pad(target_classes.reshape(N), ((0, total_cols - N),),
                  constant_values=-1)                                # sentinel pad
    tgt = tgt.reshape(R, 128)

    # Boundary loss inputs: gather matched rows (M is small; XLA gather in glue).
    src_left = pred_left[batch_idx, src_idx]                         # (M, L)
    src_right = pred_right[batch_idx, src_idx]                       # (M, L)
    spans_l = spans[:, 0:1].astype(jnp.int32)                        # (M, 1)
    spans_r = spans[:, 1:2].astype(jnp.int32)                        # (M, 1)

    # empty_weight[0]; clamp denominator against num_spans >= N degenerate case.
    w0 = num_spans / max(float(N) - num_spans, 1.0)
    kernel = _make_fused_loss_kernel(C, TB, w0, 1.0 / num_spans)

    num_p, den_p, bnd_p = pl.pallas_call(
        kernel,
        out_shape=(jax.ShapeDtypeStruct((NC * 8, 128), jnp.float32),
                   jax.ShapeDtypeStruct((NC * 8, 128), jnp.float32),
                   jax.ShapeDtypeStruct((NC * 8, 128), jnp.float32)),
        grid_spec=pltpu.PrefetchScalarGridSpec(
            num_scalar_prefetch=0,
            grid=(NC, tiles_per_core),
            in_specs=[
                pl.BlockSpec((C, TB, 128),
                             lambda c, i: (0, c * tiles_per_core + i, 0)),
                pl.BlockSpec((TB, 128),
                             lambda c, i: (c * tiles_per_core + i, 0)),
                pl.BlockSpec((M, L), lambda c, i: (0, 0)),
                pl.BlockSpec((M, L), lambda c, i: (0, 0)),
                pl.BlockSpec((M, 1), lambda c, i: (0, 0)),
                pl.BlockSpec((M, 1), lambda c, i: (0, 0)),
            ],
            out_specs=[
                pl.BlockSpec((8, 128), lambda c, i: (c, 0)),
                pl.BlockSpec((8, 128), lambda c, i: (c, 0)),
                pl.BlockSpec((8, 128), lambda c, i: (c, 0)),
            ],
            scratch_shapes=[pltpu.VMEM((8, 128), jnp.float32),
                            pltpu.VMEM((8, 128), jnp.float32)],
        ),
        compiler_params=pltpu.CompilerParams(
            dimension_semantics=("parallel", "arbitrary")),
    )(logits_t, tgt, src_left, src_right, spans_l, spans_r)

    loss_class = jnp.sum(num_p) / jnp.sum(den_p)
    loss_boundary = bnd_p[0, 0]
    return {"loss_class": loss_class, "loss_boundary": loss_boundary}


# ----------------------------------------------------------------------------
# Pure-JAX reference (sanity check).
# ----------------------------------------------------------------------------
def _reference(outputs, targets):
    pred_logits = outputs["pred_logits"]
    pred_left, pred_right = outputs["pred_boundaries"]
    B, Q, C = pred_logits.shape
    sizes = targets["sizes"]
    labels = targets["labels"]
    spans = targets["spans"]
    num_spans = float(sum(sizes))

    batch_idx = jnp.concatenate(
        [jnp.full((n,), b, dtype=jnp.int32) for b, n in enumerate(sizes)])
    src_idx = jnp.concatenate([jnp.arange(n, dtype=jnp.int32) for n in sizes])

    target_classes = jnp.zeros((B, Q), jnp.int32).at[batch_idx, src_idx].set(labels)
    logp = jax.nn.log_softmax(pred_logits.reshape(B * Q, C).astype(jnp.float32), axis=-1)
    t = target_classes.reshape(B * Q)
    w = jnp.ones((C,), jnp.float32).at[0].set(num_spans / (B * Q - num_spans))[t]
    ce = -logp[jnp.arange(B * Q), t]
    loss_class = jnp.sum(w * ce) / jnp.sum(w)

    sl = pred_left[batch_idx, src_idx]
    sr = pred_right[batch_idx, src_idx]
    M = sl.shape[0]
    nll = (-jnp.log(1e-25 + sl[jnp.arange(M), spans[:, 0]])
           - jnp.log(1e-25 + sr[jnp.arange(M), spans[:, 1]]))
    loss_boundary = jnp.sum(nll) / num_spans
    return {"loss_class": loss_class, "loss_boundary": loss_boundary}


if __name__ == "__main__":
    key = jax.random.PRNGKey(0)
    B, Q, C, L = 2, 8, 8, 16          # batch, queries, classes (incl. no-object), seq len
    sizes = [3, 2]                    # ground-truth spans per batch element
    M = sum(sizes)

    k1, k2, k3, k4, k5 = jax.random.split(key, 5)
    pred_logits = jax.random.normal(k1, (B, Q, C), dtype=jnp.float32)
    pred_left = jax.nn.softmax(jax.random.normal(k2, (B, Q, L), dtype=jnp.float32), axis=-1)
    pred_right = jax.nn.softmax(jax.random.normal(k3, (B, Q, L), dtype=jnp.float32), axis=-1)
    labels = jax.random.randint(k4, (M,), 1, C, dtype=jnp.int32)     # real classes >= 1
    spans = jax.random.randint(k5, (M, 2), 0, L, dtype=jnp.int32)    # left/right positions

    outputs = {"pred_logits": pred_logits,
               "pred_boundaries": (pred_left, pred_right)}
    targets = {"labels": labels, "spans": spans, "sizes": sizes}

    losses = criterion_forward(outputs, targets)
    losses = jax.tree_util.tree_map(jax.block_until_ready, losses)

    ref = _reference(outputs, targets)
    assert jnp.allclose(losses["loss_class"], ref["loss_class"], rtol=1e-5, atol=1e-5), \
        (losses["loss_class"], ref["loss_class"])
    assert jnp.allclose(losses["loss_boundary"], ref["loss_boundary"], rtol=1e-5, atol=1e-5), \
        (losses["loss_boundary"], ref["loss_boundary"])

    print("KERNEL_OK")
</pallas_src>

<mosaic_0001>
module attributes {stable_mosaic.version = 11 : i64} {
  func.func @kernel(%arg0: i32, %arg1: i32, %arg2: memref<8x8x128xf32, #tpu.memory_space<vmem>>, %arg3: memref<8x128xi32, #tpu.memory_space<vmem>>, %arg4: memref<5x16xf32, #tpu.memory_space<vmem>>, %arg5: memref<5x16xf32, #tpu.memory_space<vmem>>, %arg6: memref<5x1xi32, #tpu.memory_space<vmem>>, %arg7: memref<5x1xi32, #tpu.memory_space<vmem>>, %arg8: memref<8x128xf32, #tpu.memory_space<vmem>>, %arg9: memref<8x128xf32, #tpu.memory_space<vmem>>, %arg10: memref<8x128xf32, #tpu.memory_space<vmem>>, %arg11: memref<8x128xf32, #tpu.memory_space<vmem>>, %arg12: memref<8x128xf32, #tpu.memory_space<vmem>>) attributes {dimension_semantics = [#tpu.dimension_semantics<parallel>, #tpu.dimension_semantics<arbitrary>], iteration_bounds = array<i64: 2, 1>, scalar_prefetch = 0 : i64, scratch_operands = 2 : i64, tpu.core_type = #tpu.core_type<tc>, window_params = [{transform_indices = @transform_0, window_bounds = array<i64: 8, 8, 128>}, {transform_indices = @transform_1, window_bounds = array<i64: 8, 128>}, {pipeline_mode = #tpu.pipeline_mode<synchronous>, transform_indices = @transform_2, window_bounds = array<i64: 5, 16>}, {pipeline_mode = #tpu.pipeline_mode<synchronous>, transform_indices = @transform_3, window_bounds = array<i64: 5, 16>}, {pipeline_mode = #tpu.pipeline_mode<synchronous>, transform_indices = @transform_4, window_bounds = array<i64: 5, 1>}, {pipeline_mode = #tpu.pipeline_mode<synchronous>, transform_indices = @transform_5, window_bounds = array<i64: 5, 1>}, {transform_indices = @transform_6, window_bounds = array<i64: 8, 128>}, {transform_indices = @transform_7, window_bounds = array<i64: 8, 128>}, {transform_indices = @transform_8, window_bounds = array<i64: 8, 128>}]} {
    %c0_i32 = arith.constant 0 : i32
    %0 = arith.cmpi eq, %arg1, %c0_i32 : i32
    %1 = arith.extui %0 : i1 to i32
    %c0_i32_0 = arith.constant 0 : i32
    %2 = arith.cmpi ne, %1, %c0_i32_0 : i32
    scf.if %2 {
      %cst_44 = arith.constant 0.000000e+00 : f32
      %115 = vector.broadcast %cst_44 : f32 to vector<8x128xf32>
      %c0_45 = arith.constant 0 : index
      %c0_46 = arith.constant 0 : index
      %116 = vector.load %arg11[%c0_45, %c0_46] : memref<8x128xf32, #tpu.memory_space<vmem>>, vector<8x128xf32>
      tpu.vector_store %arg11[%c0_45, %c0_46], %115 {strides = array<i32>} : memref<8x128xf32, #tpu.memory_space<vmem>>, vector<8x128xf32>,
      %cst_47 = arith.constant 0.000000e+00 : f32
      %117 = vector.broadcast %cst_47 : f32 to vector<8x128xf32>
      %c0_48 = arith.constant 0 : index
      %c0_49 = arith.constant 0 : index
      %118 = vector.load %arg12[%c0_48, %c0_49] : memref<8x128xf32, #tpu.memory_space<vmem>>, vector<8x128xf32>
      tpu.vector_store %arg12[%c0_48, %c0_49], %117 {strides = array<i32>} : memref<8x128xf32, #tpu.memory_space<vmem>>, vector<8x128xf32>,
      %c0_50 = arith.constant 0 : index
      %c0_51 = arith.constant 0 : index
      %119 = vector.load %arg4[%c0_50, %c0_51] : memref<5x16xf32, #tpu.memory_space<vmem>>, vector<5x16xf32>
      %c0_52 = arith.constant 0 : index
      %c0_53 = arith.constant 0 : index
      %120 = vector.load %arg5[%c0_52, %c0_53] : memref<5x16xf32, #tpu.memory_space<vmem>>, vector<5x16xf32>
      %121 = tpu.iota {dimensions = array<i32: 1>} : vector<5x16xi32>
      %c0_54 = arith.constant 0 : index
      %c0_55 = arith.constant 0 : index
      %122 = vector.load %arg6[%c0_54, %c0_55] : memref<5x1xi32, #tpu.memory_space<vmem>>, vector<5x1xi32>
      %123 = vector.broadcast %122 : vector<5x1xi32> to vector<5x16xi32>
      %124 = arith.cmpi eq, %121, %123 : vector<5x16xi32>
      %cst_56 = arith.constant 1.000000e-25 : f32
      %125 = vector.broadcast %cst_56 : f32 to vector<5x16xf32>
      %126 = arith.addf %125, %119 : vector<5x16xf32>
      %127 = math.log %126 : vector<5x16xf32>
      %cst_57 = arith.constant 0.000000e+00 : f32
      %128 = vector.broadcast %cst_57 : f32 to vector<5x16xf32>
      %129 = arith.select %124, %127, %128 : vector<5x16xi1>, vector<5x16xf32>
      %cst_58 = arith.constant dense<0.000000e+00> : vector<5xf32>
      %130 = vector.multi_reduction <add>, %129, %cst_58 [1] : vector<5x16xf32> to vector<5xf32>
      %131 = vector.shape_cast %130 : vector<5xf32> to vector<5x1xf32>
      %c0_59 = arith.constant 0 : index
      %c0_60 = arith.constant 0 : index
      %132 = vector.load %arg7[%c0_59, %c0_60] : memref<5x1xi32, #tpu.memory_space<vmem>>, vector<5x1xi32>
      %133 = vector.broadcast %132 : vector<5x1xi32> to vector<5x16xi32>
      %134 = arith.cmpi eq, %121, %133 : vector<5x16xi32>
      %cst_61 = arith.constant 1.000000e-25 : f32
      %135 = vector.broadcast %cst_61 : f32 to vector<5x16xf32>
      %136 = arith.addf %135, %120 : vector<5x16xf32>
      %137 = math.log %136 : vector<5x16xf32>
      %cst_62 = arith.constant 0.000000e+00 : f32
      %138 = vector.broadcast %cst_62 : f32 to vector<5x16xf32>
      %139 = arith.select %134, %137, %138 : vector<5x16xi1>, vector<5x16xf32>
      %cst_63 = arith.constant dense<0.000000e+00> : vector<5xf32>
      %140 = vector.multi_reduction <add>, %139, %cst_63 [1] : vector<5x16xf32> to vector<5xf32>
      %141 = vector.shape_cast %140 : vector<5xf32> to vector<5x1xf32>
      %142 = arith.addf %131, %141 : vector<5x1xf32>
      %cst_64 = arith.constant 0.000000e+00 : f32
      %143 = vector.broadcast %cst_64 : f32 to vector<5x1xf32>
      %144 = arith.subf %143, %142 : vector<5x1xf32>
      %145 = vector.shape_cast %144 : vector<5x1xf32> to vector<1x5x1xf32>
      %cst_65 = arith.constant dense<0.000000e+00> : vector<1xf32>
      %146 = vector.multi_reduction <add>, %145, %cst_65 [1, 2] : vector<1x5x1xf32> to vector<1xf32>
      %147 = vector.shape_cast %146 : vector<1xf32> to vector<1x1x1xf32>
      %148 = vector.extract %147[0, 0, 0] : f32 from vector<1x1x1xf32>
      %149 = vector.broadcast %148 : f32 to vector<1x1xf32>
      %150 = vector.shape_cast %149 : vector<1x1xf32> to vector<1x1xf32>
      %151 = vector.broadcast %150 : vector<1x1xf32> to vector<8x128xf32>
      %cst_66 = arith.constant 2.000000e-01 : f32
      %152 = vector.broadcast %cst_66 : f32 to vector<8x128xf32>
      %153 = arith.mulf %151, %152 : vector<8x128xf32>
      %c0_67 = arith.constant 0 : index
      %c0_68 = arith.constant 0 : index
      %154 = vector.load %arg10[%c0_67, %c0_68] : memref<8x128xf32, #tpu.memory_space<vmem>>, vector<8x128xf32>
      tpu.vector_store %arg10[%c0_67, %c0_68], %153 {strides = array<i32>} : memref<8x128xf32, #tpu.memory_space<vmem>>, vector<8x128xf32>,
    } else {
    }
    %c0 = arith.constant 0 : index
    %c0_1 = arith.constant 0 : index
    %3 = vector.load %arg3[%c0, %c0_1] : memref<8x128xi32, #tpu.memory_space<vmem>>, vector<8x128xi32>
    %c0_2 = arith.constant 0 : index
    %c0_3 = arith.constant 0 : index
    %c0_4 = arith.constant 0 : index
    %4 = vector.load %arg2[%c0_2, %c0_3, %c0_4] : memref<8x8x128xf32, #tpu.memory_space<vmem>>, vector<1x8x128xf32>
    %5 = vector.shape_cast %4 : vector<1x8x128xf32> to vector<8x128xf32>
    %c1 = arith.constant 1 : index
    %c0_5 = arith.constant 0 : index
    %c0_6 = arith.constant 0 : index
    %6 = vector.load %arg2[%c1, %c0_5, %c0_6] : memref<8x8x128xf32, #tpu.memory_space<vmem>>, vector<1x8x128xf32>
    %7 = vector.shape_cast %6 : vector<1x8x128xf32> to vector<8x128xf32>
    %c2 = arith.constant 2 : index
    %c0_7 = arith.constant 0 : index
    %c0_8 = arith.constant 0 : index
    %8 = vector.load %arg2[%c2, %c0_7, %c0_8] : memref<8x8x128xf32, #tpu.memory_space<vmem>>, vector<1x8x128xf32>
    %9 = vector.shape_cast %8 : vector<1x8x128xf32> to vector<8x128xf32>
    %c3 = arith.constant 3 : index
    %c0_9 = arith.constant 0 : index
    %c0_10 = arith.constant 0 : index
    %10 = vector.load %arg2[%c3, %c0_9, %c0_10] : memref<8x8x128xf32, #tpu.memory_space<vmem>>, vector<1x8x128xf32>
    %11 = vector.shape_cast %10 : vector<1x8x128xf32> to vector<8x128xf32>
    %c4 = arith.constant 4 : index
    %c0_11 = arith.constant 0 : index
    %c0_12 = arith.constant 0 : index
    %12 = vector.load %arg2[%c4, %c0_11, %c0_12] : memref<8x8x128xf32, #tpu.memory_space<vmem>>, vector<1x8x128xf32>
    %13 = vector.shape_cast %12 : vector<1x8x128xf32> to vector<8x128xf32>
    %c5 = arith.constant 5 : index
    %c0_13 = arith.constant 0 : index
    %c0_14 = arith.constant 0 : index
    %14 = vector.load %arg2[%c5, %c0_13, %c0_14] : memref<8x8x128xf32, #tpu.memory_space<vmem>>, vector<1x8x128xf32>
    %15 = vector.shape_cast %14 : vector<1x8x128xf32> to vector<8x128xf32>
    %c6 = arith.constant 6 : index
    %c0_15 = arith.constant 0 : index
    %c0_16 = arith.constant 0 : index
    %16 = vector.load %arg2[%c6, %c0_15, %c0_16] : memref<8x8x128xf32, #tpu.memory_space<vmem>>, vector<1x8x128xf32>
    %17 = vector.shape_cast %16 : vector<1x8x128xf32> to vector<8x128xf32>
    %c7 = arith.constant 7 : index
    %c0_17 = arith.constant 0 : index
    %c0_18 = arith.constant 0 : index
    %18 = vector.load %arg2[%c7, %c0_17, %c0_18] : memref<8x8x128xf32, #tpu.memory_space<vmem>>, vector<1x8x128xf32>
    %19 = vector.shape_cast %18 : vector<1x8x128xf32> to vector<8x128xf32>
    %20 = arith.maximumf %5, %7 : vector<8x128xf32>
    %21 = arith.maximumf %20, %9 : vector<8x128xf32>
    %22 = arith.maximumf %21, %11 : vector<8x128xf32>
    %23 = arith.maximumf %22, %13 : vector<8x128xf32>
    %24 = arith.maximumf %23, %15 : vector<8x128xf32>
    %25 = arith.maximumf %24, %17 : vector<8x128xf32>
    %26 = arith.maximumf %25, %19 : vector<8x128xf32>
    %cst = arith.constant 0.000000e+00 : f32
    %27 = vector.broadcast %cst : f32 to vector<8x128xf32>
    %cst_19 = arith.constant 0.000000e+00 : f32
    %28 = vector.broadcast %cst_19 : f32 to vector<8x128xf32>
    %29 = arith.subf %5, %26 : vector<8x128xf32>
    %30 = math.exp %29 : vector<8x128xf32>
    %31 = arith.addf %27, %30 : vector<8x128xf32>
    %c0_i32_20 = arith.constant 0 : i32
    %32 = vector.broadcast %c0_i32_20 : i32 to vector<8x128xi32>
    %33 = arith.cmpi eq, %3, %32 : vector<8x128xi32>
    %cst_21 = arith.constant 0.000000e+00 : f32
    %34 = vector.broadcast %cst_21 : f32 to vector<8x128xf32>
    %35 = arith.select %33, %5, %34 : vector<8x128xi1>, vector<8x128xf32>
    %36 = arith.addf %28, %35 : vector<8x128xf32>
    %37 = arith.subf %7, %26 : vector<8x128xf32>
    %38 = math.exp %37 : vector<8x128xf32>
    %39 = arith.addf %31, %38 : vector<8x128xf32>
    %c1_i32 = arith.constant 1 : i32
    %40 = vector.broadcast %c1_i32 : i32 to vector<8x128xi32>
    %41 = arith.cmpi eq, %3, %40 : vector<8x128xi32>
    %cst_22 = arith.constant 0.000000e+00 : f32
    %42 = vector.broadcast %cst_22 : f32 to vector<8x128xf32>
    %43 = arith.select %41, %7, %42 : vector<8x128xi1>, vector<8x128xf32>
    %44 = arith.addf %36, %43 : vector<8x128xf32>
    %45 = arith.subf %9, %26 : vector<8x128xf32>
    %46 = math.exp %45 : vector<8x128xf32>
    %47 = arith.addf %39, %46 : vector<8x128xf32>
    %c2_i32 = arith.constant 2 : i32
    %48 = vector.broadcast %c2_i32 : i32 to vector<8x128xi32>
    %49 = arith.cmpi eq, %3, %48 : vector<8x128xi32>
    %cst_23 = arith.constant 0.000000e+00 : f32
    %50 = vector.broadcast %cst_23 : f32 to vector<8x128xf32>
    %51 = arith.select %49, %9, %50 : vector<8x128xi1>, vector<8x128xf32>
    %52 = arith.addf %44, %51 : vector<8x128xf32>
    %53 = arith.subf %11, %26 : vector<8x128xf32>
    %54 = math.exp %53 : vector<8x128xf32>
    %55 = arith.addf %47, %54 : vector<8x128xf32>
    %c3_i32 = arith.constant 3 : i32
    %56 = vector.broadcast %c3_i32 : i32 to vector<8x128xi32>
    %57 = arith.cmpi eq, %3, %56 : vector<8x128xi32>
    %cst_24 = arith.constant 0.000000e+00 : f32
    %58 = vector.broadcast %cst_24 : f32 to vector<8x128xf32>
    %59 = arith.select %57, %11, %58 : vector<8x128xi1>, vector<8x128xf32>
    %60 = arith.addf %52, %59 : vector<8x128xf32>
    %61 = arith.subf %13, %26 : vector<8x128xf32>
    %62 = math.exp %61 : vector<8x128xf32>
    %63 = arith.addf %55, %62 : vector<8x128xf32>
    %c4_i32 = arith.constant 4 : i32
    %64 = vector.broadcast %c4_i32 : i32 to vector<8x128xi32>
    %65 = arith.cmpi eq, %3, %64 : vector<8x128xi32>
    %cst_25 = arith.constant 0.000000e+00 : f32
    %66 = vector.broadcast %cst_25 : f32 to vector<8x128xf32>
    %67 = arith.select %65, %13, %66 : vector<8x128xi1>, vector<8x128xf32>
    %68 = arith.addf %60, %67 : vector<8x128xf32>
    %69 = arith.subf %15, %26 : vector<8x128xf32>
    %70 = math.exp %69 : vector<8x128xf32>
    %71 = arith.addf %63, %70 : vector<8x128xf32>
    %c5_i32 = arith.constant 5 : i32
    %72 = vector.broadcast %c5_i32 : i32 to vector<8x128xi32>
    %73 = arith.cmpi eq, %3, %72 : vector<8x128xi32>
    %cst_26 = arith.constant 0.000000e+00 : f32
    %74 = vector.broadcast %cst_26 : f32 to vector<8x128xf32>
    %75 = arith.select %73, %15, %74 : vector<8x128xi1>, vector<8x128xf32>
    %76 = arith.addf %68, %75 : vector<8x128xf32>
    %77 = arith.subf %17, %26 : vector<8x128xf32>
    %78 = math.exp %77 : vector<8x128xf32>
    %79 = arith.addf %71, %78 : vector<8x128xf32>
    %c6_i32 = arith.constant 6 : i32
    %80 = vector.broadcast %c6_i32 : i32 to vector<8x128xi32>
    %81 = arith.cmpi eq, %3, %80 : vector<8x128xi32>
    %cst_27 = arith.constant 0.000000e+00 : f32
    %82 = vector.broadcast %cst_27 : f32 to vector<8x128xf32>
    %83 = arith.select %81, %17, %82 : vector<8x128xi1>, vector<8x128xf32>
    %84 = arith.addf %76, %83 : vector<8x128xf32>
    %85 = arith.subf %19, %26 : vector<8x128xf32>
    %86 = math.exp %85 : vector<8x128xf32>
    %87 = arith.addf %79, %86 : vector<8x128xf32>
    %c7_i32 = arith.constant 7 : i32
    %88 = vector.broadcast %c7_i32 : i32 to vector<8x128xi32>
    %89 = arith.cmpi eq, %3, %88 : vector<8x128xi32>
    %cst_28 = arith.constant 0.000000e+00 : f32
    %90 = vector.broadcast %cst_28 : f32 to vector<8x128xf32>
    %91 = arith.select %89, %19, %90 : vector<8x128xi1>, vector<8x128xf32>
    %92 = arith.addf %84, %91 : vector<8x128xf32>
    %93 = math.log %87 : vector<8x128xf32>
    %94 = arith.addf %26, %93 : vector<8x128xf32>
    %c0_i32_29 = arith.constant 0 : i32
    %95 = vector.broadcast %c0_i32_29 : i32 to vector<8x128xi32>
    %96 = arith.cmpi eq, %3, %95 : vector<8x128xi32>
    %cst_30 = arith.constant 0.454545468 : f32
    %cst_31 = arith.constant 1.000000e+00 : f32
    %97 = vector.broadcast %cst_30 : f32 to vector<8x128xf32>
    %98 = vector.broadcast %cst_31 : f32 to vector<8x128xf32>
    %99 = arith.select %96, %97, %98 : vector<8x128xi1>, vector<8x128xf32>
    %c0_i32_32 = arith.constant 0 : i32
    %100 = vector.broadcast %c0_i32_32 : i32 to vector<8x128xi32>
    %101 = arith.cmpi slt, %3, %100 : vector<8x128xi32>
    %cst_33 = arith.constant 0.000000e+00 : f32
    %102 = vector.broadcast %cst_33 : f32 to vector<8x128xf32>
    %103 = arith.select %101, %102, %99 : vector<8x128xi1>, vector<8x128xf32>
    %104 = arith.subf %94, %92 : vector<8x128xf32>
    %105 = arith.mulf %103, %104 : vector<8x128xf32>
    %c0_34 = arith.constant 0 : index
    %c0_35 = arith.constant 0 : index
    %106 = vector.load %arg11[%c0_34, %c0_35] : memref<8x128xf32, #tpu.memory_space<vmem>>, vector<8x128xf32>
    %107 = arith.addf %106, %105 : vector<8x128xf32>
    %c0_36 = arith.constant 0 : index
    %c0_37 = arith.constant 0 : index
    %108 = vector.load %arg11[%c0_36, %c0_37] : memref<8x128xf32, #tpu.memory_space<vmem>>, vector<8x128xf32>
    tpu.vector_store %arg11[%c0_36, %c0_37], %107 {strides = array<i32>} : memref<8x128xf32, #tpu.memory_space<vmem>>, vector<8x128xf32>,
    %c0_38 = arith.constant 0 : index
    %c0_39 = arith.constant 0 : index
    %109 = vector.load %arg12[%c0_38, %c0_39] : memref<8x128xf32, #tpu.memory_space<vmem>>, vector<8x128xf32>
    %110 = arith.addf %109, %103 : vector<8x128xf32>
    %c0_40 = arith.constant 0 : index
    %c0_41 = arith.constant 0 : index
    %111 = vector.load %arg12[%c0_40, %c0_41] : memref<8x128xf32, #tpu.memory_space<vmem>>, vector<8x128xf32>
    tpu.vector_store %arg12[%c0_40, %c0_41], %110 {strides = array<i32>} : memref<8x128xf32, #tpu.memory_space<vmem>>, vector<8x128xf32>,
    %c0_i32_42 = arith.constant 0 : i32
    %112 = arith.cmpi eq, %arg1, %c0_i32_42 : i32
    %113 = arith.extui %112 : i1 to i32
    %c0_i32_43 = arith.constant 0 : i32
    %114 = arith.cmpi ne, %113, %c0_i32_43 : i32
    scf.if %114 {
      %c0_44 = arith.constant 0 : index
      %c0_45 = arith.constant 0 : index
      %115 = vector.load %arg11[%c0_44, %c0_45] : memref<8x128xf32, #tpu.memory_space<vmem>>, vector<8x128xf32>
      %c0_46 = arith.constant 0 : index
      %c0_47 = arith.constant 0 : index
      %116 = vector.load %arg8[%c0_46, %c0_47] : memref<8x128xf32, #tpu.memory_space<vmem>>, vector<8x128xf32>
      tpu.vector_store %arg8[%c0_46, %c0_47], %115 {strides = array<i32>} : memref<8x128xf32, #tpu.memory_space<vmem>>, vector<8x128xf32>,
      %c0_48 = arith.constant 0 : index
      %c0_49 = arith.constant 0 : index
      %117 = vector.load %arg12[%c0_48, %c0_49] : memref<8x128xf32, #tpu.memory_space<vmem>>, vector<8x128xf32>
      %c0_50 = arith.constant 0 : index
      %c0_51 = arith.constant 0 : index
      %118 = vector.load %arg9[%c0_50, %c0_51] : memref<8x128xf32, #tpu.memory_space<vmem>>, vector<8x128xf32>
      tpu.vector_store %arg9[%c0_50, %c0_51], %117 {strides = array<i32>} : memref<8x128xf32, #tpu.memory_space<vmem>>, vector<8x128xf32>,
    } else {
    }
    return
  }
  func.func @transform_0(%arg0: i32, %arg1: i32) -> (i32, i32, i32) {
    %c1_i32 = arith.constant 1 : i32
    %0 = arith.muli %arg0, %c1_i32 : i32
    %1 = arith.addi %0, %arg1 : i32
    %c0_i32 = arith.constant 0 : i32
    %c0_i32_0 = arith.constant 0 : i32
    %c0_i32_1 = arith.constant 0 : i32
    return %c0_i32, %1, %c0_i32_0 : i32, i32, i32
  }
  func.func @transform_1(%arg0: i32, %arg1: i32) -> (i32, i32) {
    %c1_i32 = arith.constant 1 : i32
    %0 = arith.muli %arg0, %c1_i32 : i32
    %1 = arith.addi %0, %arg1 : i32
    %c0_i32 = arith.constant 0 : i32
    %c0_i32_0 = arith.constant 0 : i32
    return %1, %c0_i32 : i32, i32
  }
  func.func @transform_2(%arg0: i32, %arg1: i32) -> (i32, i32) {
    %c0_i32 = arith.constant 0 : i32
    %c0_i32_0 = arith.constant 0 : i32
    %c0_i32_1 = arith.constant 0 : i32
    return %c0_i32, %c0_i32_0 : i32, i32
  }
  func.func @transform_3(%arg0: i32, %arg1: i32) -> (i32, i32) {
    %c0_i32 = arith.constant 0 : i32
    %c0_i32_0 = arith.constant 0 : i32
    %c0_i32_1 = arith.constant 0 : i32
    return %c0_i32, %c0_i32_0 : i32, i32
  }
  func.func @transform_4(%arg0: i32, %arg1: i32) -> (i32, i32) {
    %c0_i32 = arith.constant 0 : i32
    %c0_i32_0 = arith.constant 0 : i32
    %c0_i32_1 = arith.constant 0 : i32
    return %c0_i32, %c0_i32_0 : i32, i32
  }
  func.func @transform_5(%arg0: i32, %arg1: i32) -> (i32, i32) {
    %c0_i32 = arith.constant 0 : i32
    %c0_i32_0 = arith.constant 0 : i32
    %c0_i32_1 = arith.constant 0 : i32
    return %c0_i32, %c0_i32_0 : i32, i32
  }
  func.func @transform_6(%arg0: i32, %arg1: i32) -> (i32, i32) {
    %c0_i32 = arith.constant 0 : i32
    %c0_i32_0 = arith.constant 0 : i32
    return %arg0, %c0_i32 : i32, i32
  }
  func.func @transform_7(%arg0: i32, %arg1: i32) -> (i32, i32) {
    %c0_i32 = arith.constant 0 : i32
    %c0_i32_0 = arith.constant 0 : i32
    return %arg0, %c0_i32 : i32, i32
  }
  func.func @transform_8(%arg0: i32, %arg1: i32) -> (i32, i32) {
    %c0_i32 = arith.constant 0 : i32
    %c0_i32_0 = arith.constant 0 : i32
    return %arg0, %c0_i32 : i32, i32
  }
}

</mosaic_0001>

<bundles_post_ra>
// kernel: tpu_custom_call.1
= control target key start
LH: loop header
LB: loop body
LE: loop exit
PB: predicated region body
PF: predicated region fallthrough
CT: control target
= control target key end

     0   :  { %14 = vsyncpa [#allocation5], 0  ;;  %s1513_s0 = inlined_call_operand.hbm [shape: f32[8,16,128], index: 0, kind: input, shape index: {}]   ;;  %s1514_s1 = inlined_call_operand.vmem [shape: s32[16,128], index: 1, kind: input, shape index: {}]   ;;  %s1515_s2 = inlined_call_operand.vmem [shape: f32[5,16], index: 2, kind: input, shape index: {}]   ;;  %s1516_s3 = inlined_call_operand.hbm [shape: f32[5,16], index: 3, kind: input, shape index: {}]   ;;  %s1517_s4 = inlined_call_operand.vmem [shape: s32[5,1], index: 4, kind: input, shape index: {}]   ;;  %s1518_s5 = inlined_call_operand.vmem [shape: s32[5,1], index: 5, kind: input, shape index: {}]   ;;  %s1519_s6 = inlined_call_operand.hbm [shape: f32[16,128], index: 6, kind: output, shape index: {0}]   ;;  %s1520_s7 = inlined_call_operand.hbm [shape: f32[16,128], index: 7, kind: output, shape index: {1}]   ;;  %s1521_s8 = inlined_call_operand.hbm [shape: f32[16,128], index: 8, kind: output, shape index: {2}]  }
   0x1   :  { %16 = vsyncpa [#allocation5 + $0x1], 0 }
   0x2   :  { %17 = vsyncpa [#allocation8], 0 }
   0x3   :  { %18 = vsyncpa [#allocation6], 0 }
   0x4   :  { %20 = vsyncpa [#allocation6 + $0x1], 0 }
   0x5   :  { %21 = vsyncpa [#allocation11], 0 }
   0x6   :  { %23 = vsyncpa [#allocation11 + $0x1], 0  ;;  %s1160_s27 = smov 0   ;;  %s1162_s28 = smov 0  }
   0x7   :  { %s1164_s29 = smov 0   ;;  %s1166_s30 = smov 0  }
   0x8   :  { %s1168_s9 = smov 0   ;;  %s1170_s10 = smov 0  }
   0x9 LB: > { %1532 = sst [smem:[#allocation17_spill]] %s1083_s27  ;;  %s1191_s11 = sadd.s32 4294967295, %s1103_s10   ;;  %s1103_s10 = sphi %s1170_s10, %s29_s10   ;;  %s1099_s9 = sphi %s1168_s9, %s1561_s9   ;;  %s1095_s30 = sphi %s1166_s30, %s1560_s30   ;;  %s1091_s29 = sphi %s1164_s29, %s1559_s29   ;;  %s1087_s28 = sphi %s1162_s28, %s1558_s28   ;;  %s1083_s27 = sphi %s1160_s27, %s1557_s27  }
   0xa   : > { %1533 = sst [smem:[#allocation18_spill]] %s1103_s10  ;;  %s1522_s12 = sadd.s32 4294967294, %s1103_s10  }
   0xb   : > { %p57_p0 = scmp.ne.s32.totalorder %s1091_s29, %s1087_s28  ;;  %p58_p1 = scmp.eq.s32.totalorder %s1103_s10, 0 }
   0xc   : > { %p63_p2 = scmp.ne.s32.totalorder %s1087_s28, %s1083_s27  ;;  %p1527_p3 = scmp.eq.s32.totalorder %s1191_s11, 0 }
   0xd   : > { %p199_p4 = scmp.eq.s32.totalorder %s1191_s11, 1  ;;  %p1202_p5 = por %p58_p1, %p57_p0 }
   0xe   : > { %p205_p6 = scmp.eq.s32.totalorder %s1522_s12, 1  ;;  %p1210_p7 = por %p1527_p3, %p63_p2 }
   0xf   : > { %p1214_p8 = por %p199_p4, %p57_p0  ;;  %p759_p10 = scmp.ge.s32.totalorder %s1103_s10, 1 }
  0x10   : > { %s1535_s15 = scalar_select %p1210_p7, 1, 0 }
  0x11   : > { %s1536_s16 = scalar_select %p1214_p8, 1, 0 }
  0x12   : > { %p1218_p9 = por %p205_p6, %p63_p2  ;;  %p264_p11 = scmp.lt.s32.totalorder %s1103_s10, 3 }
  0x13   : > { %s1105_s19 = smov [#allocation7]   ;;  %p819_p1 = scmp.lt.s32.totalorder %s1103_s10, 2 }
  0x14   : > { %s1537_s17 = scalar_select %p1218_p9, 1, 0 }
  0x15   : > { %p1225_p13 = pnand %p759_p10, %p264_p11  ;;  %s280_s20 = sshll.u32 %s1105_s19, 4  ;;  %s281_s20 = int_to_ptr.vmem [resolvable:$true] %s280_s20 }
  0x16   : > { %1538 = sst [smem:[#allocation19_spill]] %s1537_s17  ;;  %p1234_p4 = pnand %p819_p1, %p1202_p5 }
  0x17   : > { %s1539_s18 = scalar_select %p1225_p13, 1, 0 }
  0x18   : > { %p800_p0 = pneg %p1225_p13  ;;  %s41_s23 = sadd.s32 1, %s1099_s9 }
  0x19   : > { %s1540_s21 = scalar_select %p1234_p4, 1, 0 }
  0x1a   : > { %p1240_p2 = pnand %p800_p0, %p1527_p3  ;;  %p1245_p6 = scmp.ge.s32.totalorder %s41_s23, 2 }
  0x1b   : > { %s297_s25 = sand.u32 1, %s1091_s29   ;;  %s899_s14 = scalar_lea.hbm %s1516_s3, 128 }
  0x1c   : > { %s1542_s24 = scalar_select %p1245_p6, 1, 0 }
  0x1d   : > { %p900_p5 = scmp.ne.s32.totalorder %s1516_s3, %s899_s14  ;;  %p901_p10 = pneg %p1240_p2 }
  0x1e   : > { %p906_p0 = scmp.lt.u32.totalorder %s899_s14, %s1516_s3 }
  0x1f   : > { %p902_p11 = pnand %p901_p10, %p900_p5 }
  0x21   : > { %p903_p1 = pneg %p902_p11 }
  0x23   : > { %p908_p12 = pnand %p906_p0, %p903_p1 }
  0x25   : > { %911 = shalt.err (!%p908_p12)
}
  0x26   : > { %s912_s27 = scalar_lea.vmem %s281_s20, 128  ;;  %p920_p7 = scmp.lt.s32.totalorder %s281_s20, %s281_s20 }
  0x27   : > { %p913_p3 = scmp.ne.s32.totalorder %s281_s20, %s912_s27  ;;  %p921_p13 = scmp.lt.s32.totalorder %s912_s27, %s912_s27 }
  0x29   : > { %p915_p9 = pnand %p913_p3, %p901_p10  ;;  %p922_p4 = por %p921_p13, %p920_p7 }
  0x2b   : > { %p916_p8 = pneg %p915_p9 }
  0x2d   : > { %p923_p6 = pnand %p922_p4, %p916_p8 }
  0x2f   : > { %926 = shalt.err (!%p923_p6)
}
  0x30   : > { %803 = dma.hbm_to_vmem [thread:$0]  (!%p1240_p2), %s1516_s3, 128, %s281_s20, [#allocation8]  }
  0x31   : > { %p1543_p3 = scmp.ne.s32.totalorder %s1542_s24, 0  ;;  %s762_s27 = sshll.u32 %s297_s25, 6 }
  0x32   : > { %s763_s17 = sshll.u32 %s1099_s9, 7  ;;  %s301_s14 = scalar_lea.vmem [#allocation4], %s762_s27 }
  0x33   : > { %s1563_s23 = smov (%p1543_p3, %s41_s23), 0  ;;  %s1276_s19 = scalar_lea.hbm %s1513_s0, %s763_s17 }
  0x34   : > { %s47_s10 = ssub.s32 %s1099_s9, %s1563_s23  ;;  %s308_s12 = sshll.u32 %s301_s14, 4  ;;  %s1283_s12 = int_to_ptr.vmem [resolvable:$true] %s308_s12 }
  0x35   : > { %p48_p7 = scmp.eq.s32.totalorder %s47_s10, 0  ;;  %s1544_s20 = sadd.s32 1, %s1091_s29 }
  0x36   : > { %s1285_s13 = scalar_lea.sflag [#allocation5], %s297_s25  ;;  %s927_s10 = scalar_lea.hbm %s1276_s19, 1024 }
  0x37   : > { %s1281_s24 = scalar_select %p48_p7, %s1091_s29, %s1544_s20  }
  0x38   : > { %p928_p8 = scmp.ne.s32.totalorder %s1276_s19, %s927_s10  ;;  %p1545_p9 = scmp.ne.s32.totalorder %s1540_s21, 0 }
  0x39   : > { %s932_s27 = scalar_lea.hbm %s1513_s0, 2048  ;;  %p933_p2 = scmp.lt.u32.totalorder %s1276_s19, %s1513_s0 }
  0x3a   : > { %p929_p12 = pneg %p1545_p9  ;;  %p934_p6 = scmp.lt.u32.totalorder %s932_s27, %s927_s10 }
  0x3b   : > { %p936_p10 = scmp.lt.u32.totalorder %s927_s10, %s1276_s19 }
  0x3c   : > { %p930_p13 = pnand %p929_p12, %p928_p8  ;;  %p935_p5 = por %p934_p6, %p933_p2 }
  0x3e   : > { %p931_p4 = pneg %p930_p13  ;;  %p937_p11 = por %p936_p10, %p935_p5 }
  0x40   : > { %p938_p1 = pnand %p937_p11, %p931_p4 }
  0x42   : > { %941 = shalt.err (!%p938_p1)
}
  0x43   : > { %s942_s25 = scalar_lea.vmem %s1283_s12, 1024  ;;  %s1106_s20 = smov [#allocation4]  }
  0x44   : > { %p943_p0 = scmp.ne.s32.totalorder %s1283_s12, %s942_s25  ;;  %s947_s17 = sshll.u32 %s1106_s20, 4  ;;  %s948_s17 = int_to_ptr.vmem [resolvable:$false] %s947_s17 }
  0x45   : > { %s949_s22 = scalar_lea.vmem %s948_s17, 2048  ;;  %p950_p8 = scmp.lt.s32.totalorder %s1283_s12, %s948_s17 }
  0x46   : > { %p945_p3 = pnand %p943_p0, %p929_p12  ;;  %p951_p13 = scmp.lt.s32.totalorder %s949_s22, %s942_s25 }
  0x48   : > { %p946_p7 = pneg %p945_p3  ;;  %p952_p2 = por %p951_p13, %p950_p8 }
  0x4a   : > { %p953_p6 = pnand %p952_p2, %p946_p7 }
  0x4c   : > { %956 = shalt.err (!%p953_p6)
}
  0x4d   : > { %s1107_s10 = smov 256   ;;  %s1108_s27 = smov 128  }
  0x4e   : > { %s1109_s26 = smov 8   ;;  %p1546_p12 = scmp.ne.s32.totalorder %s1539_s18, 0 }
  0x4f   : > { %807 = dma.hbm_to_vmem [thread:$0]  (!%p1545_p9), %s1276_s19, 1024, %s1283_s12, %s1285_s13, %s1107_s10, %s1108_s27, %s1109_s26  }
  0x50   : > { %329 = sbr.rel (%p1546_p12) target bundleno = 596 (0x254), region = 44  ;;  %s1316_s14 = sand.u32 (!%p1546_p12), 1, %s1087_s28  }
  0x51   : > { %s765_s25 = sshll.u32 (!%p1546_p12), %s1316_s14, 6  ;;  %s332_s20 = scalar_lea.sflag (!%p1546_p12), [#allocation5], %s1316_s14 }
  0x52   : > { %s1320_s17 = scalar_lea.vmem (!%p1546_p12), [#allocation4], %s765_s25  ;;  %p1547_p4 = scmp.ne.s32.totalorder (!%p1546_p12), %s1535_s15, 0 }
  0x57   : > { %1066 = dma.done.wait (%p1547_p4), %s332_s20, 1024  }
  0x58   : > { %1068 = vsyncadd (%p1547_p4), %s332_s20, 4294966272  ;;  %p1548_p9 = scmp.eq.s32.totalorder %s1191_s11, 0 }
  0x5a   : > { %1070 = dma.done.wait (%p1548_p9), [#allocation8], 128   ;;  %p1549_p5 = pmov %p1548_p9 }
  0x5b   : > { %v1110_v0 = vmov 0   ;;  %v404_v1 = vld [vmem:[%s1517_s4] sm:$0x1f]  ;;  %v402_v7 = vlaneseq  ;;  %vm413_vm0 = vcmask 126976   ;;  %vm431_vm3 = vcmask 4096   ;;  %v771_v25 = vld [vmem:[%s1320_s17 + $0x8] sm:$0xff] }
  0x5c   : > { %1072 = vsyncadd (%p1549_p5), [#allocation8], 4294967168  ;;  %876 = vset.pattern.permute.xlu0 %v1110_v0  ;;  %v417_v2 = vld [vmem:[%s1518_s5] sm:$0x1f]  ;;  %v1342_v27 = vld [vmem:[%s1320_s17 + $0x10] sm:$0xff]  ;;  %p389_p10 = scmp.lt.s32.totalorder %s1095_s30, 1 }
  0x5d   : > { %406 = vperm.xlu0 %876, %v404_v1   ;;  %v400_v3 = vld [vmem:[%s1515_s2] sm:$0x1f]  ;;  %v403_v9 = vand.u32 127, %v402_v7  ;;  %v1346_v29 = vld [vmem:[%s1320_s17 + $0x18] sm:$0xff]  ;;  %v1354_v33 = vld [vmem:[%s1320_s17 + $0x28] sm:$0xff]  ;;  %s1394_s20 = sshll.u32 %s1316_s14, 3 }
  0x5e   : > { %v409_v4 = vadd.f32 1e-25, %v400_v3  ;;  %v401_v5 = vld [vmem:[#allocation7] sm:$0x1f]  ;;  %v1358_v35 = vld [vmem:[%s1320_s17 + $0x30] sm:$0xff]  ;;  %v1362_v37 = vld [vmem:[%s1320_s17 + $0x38] sm:$0xff] }
  0x5f   : > { %v422_v6 = vadd.f32 1e-25, %v401_v5  ;;  %v446_v24 = vld [vmem:[%s1320_s17] sm:$0xff]  ;;  %s390_s22 = scalar_select %p389_p10, %s1095_s30, 1 }
  0x60   : > { %877 = vlog2.f32 %v409_v4  ;;  %v461_v26 = vmax.f32 %v446_v24, %v771_v25  ;;  %v1350_v31 = vld [vmem:[%s1320_s17 + $0x20] sm:$0xff]  ;;  %s379_s17 = scalar_lea.vmem [#allocation10], %s1394_s20  ;;  %s550_s18 = sand.u32 1, %s1191_s11  }
  0x61   : > { %419 = vperm.xlu0 %876, %v417_v2   ;;  %879 = vlog2.f32 %v422_v6  ;;  %s770_s10 = sshll.u32 %s390_s22, 3  ;;  %s1401_s21 = sshll.u32 %s1095_s30, 7 }
  0x62   : > { %v462_v28 = vmax.f32 %v461_v26, %v1342_v27  ;;  %s392_s25 = scalar_lea.vmem %s1514_s1, %s770_s10  ;;  %s1407_s15 = scalar_lea.hbm %s1520_s7, %s1401_s21 }
  0x63   : > { %v445_v5 = vld [vmem:[%s392_s25] sm:$0xff]  ;;  %s582_s13 = sshll.u32 %s379_s17, 4  ;;  %s372_s22 = scalar_lea.vmem [#allocation9], %s1394_s20  ;;  %s1409_s13 = int_to_ptr.vmem [resolvable:$true] %s582_s13 }
  0x64   : > { %v463_v30 = vmax.f32 %v462_v28, %v1346_v29  ;;  %vm472_vm4 = vcmp.eq.s32.totalorder %v445_v5, 0  ;;  %vm479_vm5 = vcmp.eq.s32.totalorder %v445_v5, 1  ;;  %vm486_vm6 = vcmp.eq.s32.totalorder %v445_v5, 2  ;;  %s1414_s10 = scalar_lea.sflag [#allocation11], %s550_s18  ;;  %s957_s30 = scalar_lea.vmem %s1409_s13, 128 }
  0x65   : > { %v473_v7 = vsel %vm472_vm4, %v446_v24, 0.0  ;;  %vm493_vm7 = vcmp.eq.s32.totalorder %v445_v5, 3  ;;  %vm500_vm8 = vcmp.eq.s32.totalorder %v445_v5, 4  ;;  %vm507_vm9 = vcmp.eq.s32.totalorder %v445_v5, 5  ;;  %p958_p11 = scmp.ne.s32.totalorder %s1409_s13, %s957_s30  ;;  %p1550_p1 = scmp.ne.s32.totalorder %s1536_s16, 0 }
  0x66   : > { %v464_v32 = vmax.f32 %v463_v30, %v1350_v31  ;;  %vm514_vm10 = vcmp.eq.s32.totalorder %v445_v5, 6  ;;  %vm521_vm11 = vcmp.eq.s32.totalorder %v445_v5, 7  ;;  %vm528_vm12 = vcmp.lt.s32.totalorder %v445_v5, 0  ;;  %s1112_s11 = smov [#allocation10]  }
  0x67   : > { %p959_p0 = pnand %p958_p11, %p1550_p1  ;;  %s961_s27 = sshll.u32 %s1112_s11, 4  ;;  %s962_s27 = int_to_ptr.vmem [resolvable:$false] %s961_s27 }
  0x68   : > { %v465_v34 = vmax.f32 %v464_v32, %v1354_v33  ;;  %s963_s26 = scalar_lea.vmem %s962_s27, 256  ;;  %p964_p7 = scmp.lt.s32.totalorder %s1409_s13, %s962_s27 }
  0x69   : > { %p960_p3 = pneg %p959_p0  ;;  %p965_p8 = scmp.lt.s32.totalorder %s963_s26, %s957_s30 }
  0x6a   : > { %v878_v8 = vpop.eup %877  ;;  %v466_v36 = vmax.f32 %v465_v34, %v1358_v35 }
  0x6b   : > { %v411_v10 = vmul.f32 0.6931472, %v878_v8  ;;  %v880_v11 = vpop.eup %879  ;;  %v480_v8 = vsel %vm479_vm5, %v771_v25, 0.0  ;;  %p966_p13 = por %p965_p8, %p964_p7 }
  0x6c   : > { %v424_v14 = vmul.f32 0.6931472, %v880_v11  ;;  %v1365_v38 = vmax.f32 %v466_v36, %v1362_v37 }
  0x6d   : > { %p967_p2 = pnand %p966_p13, %p960_p3 }
  0x6e   : > { %v468_v39 = vsub.f32 %v446_v24, %v1365_v38  ;;  %v475_v40 = vsub.f32 %v771_v25, %v1365_v38  ;;  %v482_v43 = vsub.f32 %v1342_v27, %v1365_v38  ;;  %v489_v45 = vsub.f32 %v1346_v29, %v1365_v38 }
  0x6f   : > { %v496_v47 = vsub.f32 %v1350_v31, %v1365_v38  ;;  %v503_v49 = vsub.f32 %v1354_v33, %v1365_v38  ;;  %v510_v51 = vsub.f32 %v1358_v35, %v1365_v38  ;;  %v517_v53 = vsub.f32 %v1362_v37, %v1365_v38 }
  0x70   : > { %v469_v41 = vmul.f32 1.442695, %v468_v39  ;;  %v476_v42 = vmul.f32 1.442695, %v475_v40  ;;  %v483_v44 = vmul.f32 1.442695, %v482_v43 }
  0x71   : > { %v490_v46 = vmul.f32 1.442695, %v489_v45  ;;  %v497_v48 = vmul.f32 1.442695, %v496_v47  ;;  %v504_v50 = vmul.f32 1.442695, %v503_v49 }
  0x72   : > { %881 = vpow2.f32 %v469_v41  ;;  %v511_v52 = vmul.f32 1.442695, %v510_v51  ;;  %v518_v55 = vmul.f32 1.442695, %v517_v53  ;;  %v1111_v25 = vmov 1.0  }
  0x73   : > { %883 = vpow2.f32 %v476_v42  ;;  %v527_v26 = vsel %vm472_vm4, 0.45454547, %v1111_v25 }
  0x74   : > { %885 = vpow2.f32 %v483_v44 }
  0x75   : > { %887 = vpow2.f32 %v490_v46 }
  0x76   : > { %889 = vpow2.f32 %v497_v48 }
  0x77   : > { %891 = vpow2.f32 %v504_v50 }
  0x78   : > { %893 = vpow2.f32 %v511_v52 }
  0x79   : > { %895 = vpow2.f32 %v518_v55 }
  0x7c   : > { %v882_v54 = vpop.eup %881 }
  0x7d   : > { %v884_v56 = vpop.eup %883 }
  0x7e   : > { %v886_v57 = vpop.eup %885  ;;  %v478_v58 = vadd.f32 %v884_v56, %v882_v54 }
  0x7f   : > { %v888_v59 = vpop.eup %887 }
  0x80   : > { %v485_v60 = vadd.f32 %v886_v57, %v478_v58  ;;  %v890_v61 = vpop.eup %889 }
  0x81   : > { %v892_v63 = vpop.eup %891 }
  0x82   : > { %v492_v62 = vadd.f32 %v888_v59, %v485_v60  ;;  %v894_v1 = vpop.eup %893 }
  0x83   : > { %v896_v3 = vpop.eup %895 }
  0x84   : > { %v499_v0 = vadd.f32 %v890_v61, %v492_v62 }
  0x86   : > { %v506_v2 = vadd.f32 %v892_v63, %v499_v0 }
  0x88   : > { %v513_v4 = vadd.f32 %v894_v1, %v506_v2 }
  0x8a   : > { %v520_v6 = vadd.f32 %v896_v3, %v513_v4 }
  0x8c   : > { %897 = vlog2.f32 %v520_v6 }
  0xdc   : > { %v407_v12 = vpop.permute.xlu0 %406 }
  0xdd   : > { %vm408_vm1 = vcmp.eq.s32.totalorder %v403_v9, %v407_v12  ;;  %v494_v12 = vsel %vm493_vm7, %v1346_v29, 0.0 }
  0xde   : > { %v412_v13 = vsel %vm408_vm1, %v411_v10, 0.0  ;;  %v487_v10 = vsel %vm486_vm6, %v1342_v27, 0.0  ;;  %v529_v27 = vsel %vm528_vm12, 0.0, %v527_v26 }
  0xdf   : > { %v414_v15 = vsel %vm413_vm0, %v412_v13, 0.0  ;;  %544 = vst [vmem:[%s379_s17] sm:$0xff] %v529_v27 }
  0xe0   : > { %v420_v16 = vpop.permute.xlu0 %419  ;;  %415 = vadd.xlane.f32.xlu1 %v414_v15 }
  0xe1   : > { %vm421_vm2 = vcmp.eq.s32.totalorder %v403_v9, %v420_v16  ;;  %v481_v9 = vadd.f32 %v480_v8, %v473_v7  ;;  %v508_v16 = vsel %vm507_vm9, %v1354_v33, 0.0 }
  0xe2   : > { %v425_v17 = vsel %vm421_vm2, %v424_v14, 0.0  ;;  %v501_v14 = vsel %vm500_vm8, %v1350_v31, 0.0 }
  0xe3   : > { %v426_v18 = vsel %vm413_vm0, %v425_v17, 0.0  ;;  %v488_v11 = vadd.f32 %v487_v10, %v481_v9 }
  0xe4   : > { %427 = vadd.xlane.f32.xlu1 %v426_v18  ;;  %v515_v18 = vsel %vm514_vm10, %v1358_v35, 0.0 }
  0xe5   : > { %v495_v13 = vadd.f32 %v494_v12, %v488_v11 }
  0xe7   : > { %v502_v15 = vadd.f32 %v501_v14, %v495_v13 }
  0xe9   : > { %v509_v17 = vadd.f32 %v508_v16, %v502_v15 }
 0x16d   : > { %v416_v19 = vpop.xlane.xlu1 %415 }
 0x171   : > { %v428_v20 = vpop.xlane.xlu1 %427 }
 0x172   : > { %v429_v21 = vadd.f32 %v428_v20, %v416_v19  ;;  %v898_v19 = vpop.eup %897  ;;  %v516_v20 = vadd.f32 %v515_v18, %v509_v17 }
 0x174   : > { %v430_v22 = vsub.f32 0.0, %v429_v21  ;;  %v522_v21 = vsel %vm521_vm11, %v1362_v37, 0.0 }
 0x176   : > { %v432_v23 = vsel %vm431_vm3, %v430_v22, 0.0  ;;  %v525_v22 = vmul.f32 0.6931472, %v898_v19 }
 0x177   : > { %433 = vadd.xlane.f32.xlu0 %v432_v23  ;;  %v523_v23 = vadd.f32 %v522_v21, %v516_v20 }
 0x178   : > { %v526_v24 = vadd.f32 %v525_v22, %v1365_v38 }
 0x17a   : > { %v530_v28 = vsub.f32 %v526_v24, %v523_v23 }
 0x17c   : > { %v531_v29 = vmul.f32 %v530_v28, %v529_v27 }
 0x17e   : > { %542 = vst [vmem:[%s372_s22] sm:$0xff] %v531_v29 }
 0x17f   : > { %970 = shalt.err (!%p967_p2)
}
 0x180   : > { %s971_s25 = scalar_lea.hbm %s1407_s15, 128  ;;  %s975_s19 = scalar_lea.hbm %s1520_s7, 256 }
 0x181   : > { %p972_p6 = scmp.ne.s32.totalorder %s1407_s15, %s971_s25  ;;  %p976_p9 = scmp.lt.u32.totalorder %s1407_s15, %s1520_s7 }
 0x182   : > { %p977_p5 = scmp.lt.u32.totalorder %s975_s19, %s971_s25  ;;  %p979_p11 = scmp.lt.u32.totalorder %s971_s25, %s1407_s15 }
 0x183   : > { %p973_p12 = pnand %p972_p6, %p1550_p1 }
 0x184   : > { %p978_p10 = por %p977_p5, %p976_p9 }
 0x185   : > { %p974_p4 = pneg %p973_p12 }
 0x186   : > { %p980_p0 = por %p979_p11, %p978_p10 }
 0x188   : > { %p981_p3 = pnand %p980_p0, %p974_p4 }
 0x18a   : > { %984 = shalt.err (!%p981_p3)
}
 0x18b   : > { %795 = dma.vmem_to_hbm [thread:$0]  (%p1550_p1), %s1409_s13, 128, %s1407_s15, %s1414_s10  }
 0x18c   : > { %s1442_s26 = scalar_lea.hbm %s1519_s6, %s1401_s21  ;;  %s569_s25 = sshll.u32 %s372_s22, 4  ;;  %s570_s25 = int_to_ptr.vmem [resolvable:$true] %s569_s25 }
 0x18d   : > { %s546_s17 = scalar_lea.sflag [#allocation6], %s1316_s14  ;;  %s985_s18 = scalar_lea.vmem %s570_s25, 128 }
 0x18e   : > { %p986_p7 = scmp.ne.s32.totalorder %s570_s25, %s985_s18  ;;  %s1113_s19 = smov [#allocation9]  }
 0x18f   : > { %s989_s12 = sshll.u32 %s1113_s19, 4  ;;  %s990_s12 = int_to_ptr.vmem [resolvable:$false] %s989_s12 }
 0x190   : > { %p987_p8 = pnand %p986_p7, %p1550_p1  ;;  %s991_s11 = scalar_lea.vmem %s990_s12, 256 }
 0x191   : > { %p992_p2 = scmp.lt.s32.totalorder %s570_s25, %s990_s12  ;;  %p993_p6 = scmp.lt.s32.totalorder %s991_s11, %s985_s18 }
 0x192   : > { %p988_p13 = pneg %p987_p8 }
 0x193   : > { %p994_p12 = por %p993_p6, %p992_p2 }
 0x195   : > { %p995_p4 = pnand %p994_p12, %p988_p13 }
 0x197   : > { %998 = shalt.err (!%p995_p4)
}
 0x198   : > { %s999_s14 = scalar_lea.hbm %s1442_s26, 128  ;;  %s1003_s22 = scalar_lea.hbm %s1519_s6, 256 }
 0x199   : > { %p1000_p9 = scmp.ne.s32.totalorder %s1442_s26, %s999_s14  ;;  %p1004_p11 = scmp.lt.u32.totalorder %s1442_s26, %s1519_s6 }
 0x19a   : > { %p1005_p0 = scmp.lt.u32.totalorder %s1003_s22, %s999_s14  ;;  %p1007_p7 = scmp.lt.u32.totalorder %s999_s14, %s1442_s26 }
 0x19b   : > { %p1001_p5 = pnand %p1000_p9, %p1550_p1 }
 0x19c   : > { %p1006_p3 = por %p1005_p0, %p1004_p11 }
 0x19d   : > { %p1002_p10 = pneg %p1001_p5 }
 0x19e   : > { %p1008_p8 = por %p1007_p7, %p1006_p3 }
 0x1a0   : > { %p1009_p13 = pnand %p1008_p8, %p1002_p10 }
 0x1a2   : > { %1012 = shalt.err (!%p1009_p13)
}
 0x1a3   : > { %794 = dma.vmem_to_hbm [thread:$0]  (%p1550_p1), %s570_s25, 128, %s1442_s26, %s546_s17  }
 0x1a4   : > { %s386_s18 = scalar_lea.vmem [#allocation12], %s1394_s20  ;;  %s593_s26 = scalar_lea.hbm %s1521_s8, %s1401_s21 }
 0x1a5   : > { %s595_s19 = sshll.u32 %s386_s18, 4  ;;  %s1114_s20 = smov [#allocation12]   ;;  %s1465_s19 = int_to_ptr.vmem [resolvable:$true] %s595_s19 }
 0x1a6   : > { %s1013_s25 = scalar_lea.vmem %s1465_s19, 128  ;;  %s1017_s17 = sshll.u32 %s1114_s20, 4  ;;  %s1018_s17 = int_to_ptr.vmem [resolvable:$false] %s1017_s17 }
 0x1a7   : > { %p1014_p2 = scmp.ne.s32.totalorder %s1465_s19, %s1013_s25  ;;  %s1019_s15 = scalar_lea.vmem %s1018_s17, 256 }
 0x1a8   : > { %p1020_p4 = scmp.lt.s32.totalorder %s1465_s19, %s1018_s17  ;;  %p1021_p9 = scmp.lt.s32.totalorder %s1019_s15, %s1013_s25 }
 0x1a9   : > { %p1015_p6 = pnand %p1014_p2, %p1550_p1 }
 0x1aa   : > { %p1022_p5 = por %p1021_p9, %p1020_p4 }
 0x1ab   : > { %p1016_p12 = pneg %p1015_p6 }
 0x1ad   : > { %p1023_p10 = pnand %p1022_p5, %p1016_p12 }
 0x204   : > { %v434_v30 = vpop.xlane.xlu0 %433 }
 0x205   : > { %v435_v31 = vrot.slane %v434_v30, 4 }
 0x207   : > { %v436_v32 = vadd.f32 %v435_v31, %v434_v30 }
 0x209   : > { %v437_v33 = vrot.slane %v436_v32, 2 }
 0x20b   : > { %v438_v34 = vadd.f32 %v437_v33, %v436_v32 }
 0x20d   : > { %v439_v35 = vrot.slane %v438_v34, 1 }
 0x20f   : > { %v440_v36 = vadd.f32 %v439_v35, %v438_v34 }
 0x211   : > { %786 = vpush %v440_v36 }
 0x242   : > { %s787_s12 = spop %786 }
 0x243   : > { %v442_v37 = vstv %s787_s12 }
 0x244   : > { %v443_v38 = vmul.f32 0.2, %v442_v37 }
 0x246   : > { %444 = vst [vmem:[%s386_s18] sm:$0xff] %v443_v38 }
 0x247   : > { %1026 = shalt.err (!%p1023_p10)
}
 0x248   : > { %s1027_s13 = scalar_lea.hbm %s593_s26, 128  ;;  %s1031_s30 = scalar_lea.hbm %s1521_s8, 256 }
 0x249   : > { %p1028_p11 = scmp.ne.s32.totalorder %s593_s26, %s1027_s13  ;;  %p1032_p7 = scmp.lt.u32.totalorder %s593_s26, %s1521_s8 }
 0x24a   : > { %p1033_p8 = scmp.lt.u32.totalorder %s1031_s30, %s1027_s13  ;;  %p1035_p2 = scmp.lt.u32.totalorder %s1027_s13, %s593_s26 }
 0x24b   : > { %p1029_p0 = pnand %p1028_p11, %p1550_p1 }
 0x24c   : > { %p1034_p13 = por %p1033_p8, %p1032_p7 }
 0x24d   : > { %p1030_p3 = pneg %p1029_p0 }
 0x24e   : > { %p1036_p6 = por %p1035_p2, %p1034_p13 }
 0x250   : > { %p1037_p12 = pnand %p1036_p6, %p1030_p3 }
 0x252   : > { %1040 = shalt.err (!%p1037_p12)
}
 0x253   : > { %796 = dma.vmem_to_hbm [thread:$0]  (%p1550_p1), %s1465_s19, 128, %s593_s26, %s1414_s10  }
 0x254 PF: > { %s1551_s12 = sld [smem:[#allocation17_spill]]  ;;  %s1552_s11 = sld [smem:[#allocation19_spill]] }
 0x255   : > { %s1553_s14 = sld [smem:[#allocation18_spill]] }
 0x25a   : > { %s607_s25 = sand.u32 1, %s1551_s12   ;;  %p1554_p4 = scmp.ne.s32.totalorder %s1552_s11, 0 }
 0x25b   : > { %p1555_p9 = scmp.ge.s32.totalorder %s1553_s14, 2  ;;  %s608_s20 = scalar_lea.sflag [#allocation6], %s607_s25 }
 0x25d   : > { %p809_p5 = pnand %p1555_p9, %p1554_p4 }
 0x25f   : > { %1074 = dma.done.wait (!%p809_p5), %s608_s20, 128  }
 0x260   : > { %1076 = vsyncadd (!%p809_p5), %s608_s20, 4294967168  ;;  %s1556_s17 = sadd.s32 4294967294, %s1553_s14  }
 0x261   : > { %s616_s15 = sand.u32 1, %s1556_s17  }
 0x262   : > { %s617_s13 = scalar_lea.sflag [#allocation11], %s616_s15 }
 0x263   : > { %1078 = dma.done.wait (!%p809_p5), %s617_s13, 256  }
 0x264   : > { %1080 = vsyncadd (!%p809_p5), %s617_s13, 4294967040  ;;  %s29_s10 = sadd.s32 1, %s1553_s14   ;;  %s1557_s27 = smov %s1087_s28 }
 0x265   : > { %p26_p1 = scmp.ge.s32.totalorder %s29_s10, 4   ;;  %s1558_s28 = smov %s1091_s29 }
 0x266   : > { %s1559_s29 = smov %s1281_s24  ;;  %s1560_s30 = smov %s1099_s9 }
 0x267   : > { %s1561_s9 = smov %s1563_s23  ;;  %28 = sbr.rel (!%p26_p1) target bundleno = 9 (0x9), region = 143 }
 0x26e   :  { %631 = vsyncpa [#allocation5], 1 }
 0x26f   :  { %633 = vsyncpa [#allocation5 + $0x1], 1 }
 0x270   :  { %634 = vsyncpa [#allocation8], 1 }
 0x271   :  { %635 = vsyncpa [#allocation6], 1 }
 0x272   :  { %637 = vsyncpa [#allocation6 + $0x1], 1 }
 0x273   :  { %638 = vsyncpa [#allocation11], 1 }
 0x274   :  { %640 = vsyncpa [#allocation11 + $0x1], 1 }

</bundles_post_ra>
